<compile_context>
chip_gen: v5e
topology: v5e:2x2
jax: 0.10.0
libtpu: 0.0.40
codegen_flags: <defaults>
</compile_context>

<pallas_src>
import functools

import jax
import jax.numpy as jnp
from jax import lax
from jax.experimental import pallas as pl
from jax.experimental.pallas import tpu as pltpu


def encoder_kernel(x_ref,
                   w1_ref, b1_ref,
                   w2_ref, b2_ref,
                   w3_ref, b3_ref,
                   w4_ref, b4_ref,
                   o_ref,
                   *, chunk):
    """Fused 4-layer MLP forward for one (bt, D) batch tile.

    x_ref:  (bt, D)        -- natural row-major input tile (batch on sublanes)
    w*_ref: (out, in)      -- PyTorch Linear layout, resident across grid steps
    b*_ref: (out, 1)
    o_ref:  (latent, bt)   -- lane-dense output (batch on lanes, unmasked vst)

    The tile is processed in `chunk`-lane sub-slices so (features, chunk)
    activations stay inside the 64-vreg file even for large bt.
    """
    n_chunks = x_ref.shape[0] // chunk

    def body(c, carry):
        start = pl.multiple_of(c * chunk, chunk)
        # (chunk, D) -> (D, chunk): in-VMEM transpose (XLU), batch maps to lanes.
        h = x_ref[pl.ds(start, chunk), :].T

        h = jnp.dot(w1_ref[...], h.astype(w1_ref.dtype),
                    preferred_element_type=jnp.float32) + b1_ref[...]
        h = jnp.maximum(h, 0.0)                                   # ReLU

        h = jnp.dot(w2_ref[...], h.astype(w2_ref.dtype),
                    preferred_element_type=jnp.float32) + b2_ref[...]
        h = jnp.maximum(h, 0.0)                                   # ReLU

        h = jnp.dot(w3_ref[...], h.astype(w3_ref.dtype),
                    preferred_element_type=jnp.float32) + b3_ref[...]
        h = jnp.maximum(h, 0.0)                                   # ReLU

        h = jnp.dot(w4_ref[...], h.astype(w4_ref.dtype),
                    preferred_element_type=jnp.float32) + b4_ref[...]
        o_ref[:, pl.ds(start, chunk)] = jnp.tanh(h)               # Tanh
        return carry

    lax.fori_loop(0, n_chunks, body, 0, unroll=True)


def old_encoder_forward(x, params, *, batch_tile=2048, compute_chunk=512,
                        compute_dtype=jnp.float32, transpose_output=True):
    """x: (B, in_features).  params: torch-layout w1..w4 (out, in), b1..b4 (out,).

    Returns (B, latent) float32 (or (latent, B) if transpose_output=False).
    """
    B, D = x.shape
    latent = params["w4"].shape[0]

    # --- tile-size selection --------------------------------------------------
    B128 = ((B + 127) // 128) * 128            # batch rounded up to lane width
    bt = max(128, (int(batch_tile) // 128) * 128)
    if B128 >= 256:
        # Keep >= 2 grid steps so the "parallel" axis can shard across v7x's 2 TCs.
        bt = min(bt, max(128, (B128 // 2 // 128) * 128))
    else:
        bt = min(bt, B128)
    chunk = max(128, (int(compute_chunk) // 128) * 128)
    if bt > chunk:
        bt = (bt // chunk) * chunk             # compute chunks tile the DMA block evenly
    chunk = min(chunk, bt)
    grid_n = -(-B // bt)                       # cdiv; Pallas clips the ragged last block

    x = x.astype(jnp.float32)

    # Weights in torch (out, in) layout; biases as (out, 1) columns for lane-broadcast.
    w = [params[f"w{i}"].astype(compute_dtype) for i in (1, 2, 3, 4)]
    b = [params[f"b{i}"].astype(jnp.float32).reshape(-1, 1) for i in (1, 2, 3, 4)]

    def resident(shape):  # constant block index -> fetched once, stays resident in VMEM
        return pl.BlockSpec(shape, lambda i: (0, 0))

    x_spec_kwargs = {}
    if grid_n >= 3:
        # Per-step compute is tiny; a third input buffer hides DMA issue latency.
        x_spec_kwargs["pipeline_mode"] = pl.Buffered(3)
    in_specs = [pl.BlockSpec((bt, D), lambda i: (i, 0), **x_spec_kwargs)]
    for wi, bi in zip(w, b):
        in_specs += [resident(wi.shape), resident(bi.shape)]

    out_spec = pl.BlockSpec((latent, bt), lambda i: (0, i))   # lane-dense output

    out_t = pl.pallas_call(
        functools.partial(encoder_kernel, chunk=chunk),
        out_shape=jax.ShapeDtypeStruct((latent, B), jnp.float32),
        grid_spec=pltpu.PrefetchScalarGridSpec(
            num_scalar_prefetch=0,
            grid=(grid_n,),
            in_specs=in_specs,
            out_specs=out_spec,
        ),
        compiler_params=pltpu.CompilerParams(
            dimension_semantics=("parallel",)),
    )(x, w[0], b[0], w[1], b[1], w[2], b[2], w[3], b[3])

    # (latent, B) feature-major; transpose back for torch-compatible (B, latent).
    return out_t.T if transpose_output else out_t


def init_params(key, in_features, latent_features=5, layers_factor=8):
    """Deterministic synthetic init matching OldEncoder layer shapes (torch layout)."""
    coder_layers = [4 * layers_factor, 2 * layers_factor, 1 * layers_factor]
    dims = [in_features] + coder_layers + [latent_features]
    params = {}
    keys = jax.random.split(key, 2 * (len(dims) - 1))
    for li in range(len(dims) - 1):
        fan_in, fan_out = dims[li], dims[li + 1]
        bound = 1.0 / jnp.sqrt(jnp.float32(fan_in))
        w = jax.random.uniform(keys[2 * li], (fan_out, fan_in), jnp.float32,
                               minval=-bound, maxval=bound)
        b_ = jax.random.uniform(keys[2 * li + 1], (fan_out,), jnp.float32,
                                minval=-bound, maxval=bound)
        params[f"w{li + 1}"] = w
        params[f"b{li + 1}"] = b_
    return params


def reference_forward(x, params):
    """Plain-JAX reference (torch semantics: y = x @ W.T + b)."""
    h = jnp.maximum(x @ params["w1"].T + params["b1"], 0.0)
    h = jnp.maximum(h @ params["w2"].T + params["b2"], 0.0)
    h = jnp.maximum(h @ params["w3"].T + params["b3"], 0.0)
    return jnp.tanh(h @ params["w4"].T + params["b4"])


if __name__ == "__main__":
    key = jax.random.PRNGKey(0)
    k_param, k_x1, k_x2 = jax.random.split(key, 3)

    in_features = 32
    latent_features = 5
    layers_factor = 8

    params = init_params(k_param, in_features, latent_features, layers_factor)

    # Case 1: tiny batch -> grid=(1,), single compute chunk, clipped (bt > B) block.
    x_small = jax.random.normal(k_x1, (16, in_features), jnp.float32)
    out_small = jax.block_until_ready(old_encoder_forward(x_small, params))
    ref_small = reference_forward(x_small, params)
    assert out_small.shape == (16, latent_features)
    assert jnp.allclose(out_small, ref_small, atol=1e-5, rtol=1e-5), "small-batch mismatch"

    # Case 2: ragged batch -> grid=(4,), Buffered(3) input pipeline, 2 compute
    # chunks per tile, ragged last block handled by Pallas clipping.
    x_big = jax.random.normal(k_x2, (1600, in_features), jnp.float32)
    out_big = jax.block_until_ready(
        old_encoder_forward(x_big, params, batch_tile=512, compute_chunk=256))
    ref_big = reference_forward(x_big, params)
    assert out_big.shape == (1600, latent_features)
    assert jnp.allclose(out_big, ref_big, atol=1e-5, rtol=1e-5), "large-batch mismatch"

    print("KERNEL_OK")
</pallas_src>

<mosaic_0001>
module attributes {stable_mosaic.version = 11 : i64} {
  func.func @encoder_kernel(%arg0: i32, %arg1: memref<128x32xf32, #tpu.memory_space<vmem>>, %arg2: memref<32x32xf32, #tpu.memory_space<vmem>>, %arg3: memref<32x1xf32, #tpu.memory_space<vmem>>, %arg4: memref<16x32xf32, #tpu.memory_space<vmem>>, %arg5: memref<16x1xf32, #tpu.memory_space<vmem>>, %arg6: memref<8x16xf32, #tpu.memory_space<vmem>>, %arg7: memref<8x1xf32, #tpu.memory_space<vmem>>, %arg8: memref<5x8xf32, #tpu.memory_space<vmem>>, %arg9: memref<5x1xf32, #tpu.memory_space<vmem>>, %arg10: memref<5x128xf32, #tpu.memory_space<vmem>>) attributes {dimension_semantics = [#tpu.dimension_semantics<parallel>], iteration_bounds = array<i64: 1>, scalar_prefetch = 0 : i64, scratch_operands = 0 : i64, tpu.core_type = #tpu.core_type<tc>, window_params = [{transform_indices = @transform_0, window_bounds = array<i64: 128, 32>}, {pipeline_mode = #tpu.pipeline_mode<synchronous>, transform_indices = @transform_1, window_bounds = array<i64: 32, 32>}, {pipeline_mode = #tpu.pipeline_mode<synchronous>, transform_indices = @transform_2, window_bounds = array<i64: 32, 1>}, {pipeline_mode = #tpu.pipeline_mode<synchronous>, transform_indices = @transform_3, window_bounds = array<i64: 16, 32>}, {pipeline_mode = #tpu.pipeline_mode<synchronous>, transform_indices = @transform_4, window_bounds = array<i64: 16, 1>}, {pipeline_mode = #tpu.pipeline_mode<synchronous>, transform_indices = @transform_5, window_bounds = array<i64: 8, 16>}, {pipeline_mode = #tpu.pipeline_mode<synchronous>, transform_indices = @transform_6, window_bounds = array<i64: 8, 1>}, {pipeline_mode = #tpu.pipeline_mode<synchronous>, transform_indices = @transform_7, window_bounds = array<i64: 5, 8>}, {pipeline_mode = #tpu.pipeline_mode<synchronous>, transform_indices = @transform_8, window_bounds = array<i64: 5, 1>}, {transform_indices = @transform_9, window_bounds = array<i64: 5, 128>}]} {
    %c0_i32 = arith.constant 0 : i32
    %c128_i32 = arith.constant 128 : i32
    %0 = arith.muli %c0_i32, %c128_i32 : i32
    %1 = tpu.assume_multiple %0, 128 : i32
    %2 = arith.index_cast %1 : i32 to index
    %c0 = arith.constant 0 : index
    %3 = vector.load %arg1[%2, %c0] : memref<128x32xf32, #tpu.memory_space<vmem>>, vector<128x32xf32>
    %4 = tpu.transpose %3, [1, 0] : vector<128x32xf32> -> vector<32x128xf32>
    %c0_0 = arith.constant 0 : index
    %c0_1 = arith.constant 0 : index
    %5 = vector.load %arg2[%c0_0, %c0_1] : memref<32x32xf32, #tpu.memory_space<vmem>>, vector<32x32xf32>
    %cst = arith.constant dense<0.000000e+00> : vector<32x128xf32>
    %6 = tpu.matmul %5, %4, %cst {dimension_numbers = #tpu.dot_dimension_numbers<[1], [0], [0], [1], [0, 0, 1, 1], [], []>} : vector<32x32xf32>, vector<32x128xf32>, vector<32x128xf32> -> vector<32x128xf32>
    %c0_2 = arith.constant 0 : index
    %c0_3 = arith.constant 0 : index
    %7 = vector.load %arg3[%c0_2, %c0_3] : memref<32x1xf32, #tpu.memory_space<vmem>>, vector<32x1xf32>
    %8 = vector.broadcast %7 : vector<32x1xf32> to vector<32x128xf32>
    %9 = arith.addf %6, %8 : vector<32x128xf32>
    %cst_4 = arith.constant 0.000000e+00 : f32
    %10 = vector.broadcast %cst_4 : f32 to vector<32x128xf32>
    %11 = arith.maximumf %9, %10 : vector<32x128xf32>
    %c0_5 = arith.constant 0 : index
    %c0_6 = arith.constant 0 : index
    %12 = vector.load %arg4[%c0_5, %c0_6] : memref<16x32xf32, #tpu.memory_space<vmem>>, vector<16x32xf32>
    %cst_7 = arith.constant dense<0.000000e+00> : vector<16x128xf32>
    %13 = tpu.matmul %12, %11, %cst_7 {dimension_numbers = #tpu.dot_dimension_numbers<[1], [0], [0], [1], [0, 0, 1, 1], [], []>} : vector<16x32xf32>, vector<32x128xf32>, vector<16x128xf32> -> vector<16x128xf32>
    %c0_8 = arith.constant 0 : index
    %c0_9 = arith.constant 0 : index
    %14 = vector.load %arg5[%c0_8, %c0_9] : memref<16x1xf32, #tpu.memory_space<vmem>>, vector<16x1xf32>
    %15 = vector.broadcast %14 : vector<16x1xf32> to vector<16x128xf32>
    %16 = arith.addf %13, %15 : vector<16x128xf32>
    %cst_10 = arith.constant 0.000000e+00 : f32
    %17 = vector.broadcast %cst_10 : f32 to vector<16x128xf32>
    %18 = arith.maximumf %16, %17 : vector<16x128xf32>
    %c0_11 = arith.constant 0 : index
    %c0_12 = arith.constant 0 : index
    %19 = vector.load %arg6[%c0_11, %c0_12] : memref<8x16xf32, #tpu.memory_space<vmem>>, vector<8x16xf32>
    %cst_13 = arith.constant dense<0.000000e+00> : vector<8x128xf32>
    %20 = tpu.matmul %19, %18, %cst_13 {dimension_numbers = #tpu.dot_dimension_numbers<[1], [0], [0], [1], [0, 0, 1, 1], [], []>} : vector<8x16xf32>, vector<16x128xf32>, vector<8x128xf32> -> vector<8x128xf32>
    %c0_14 = arith.constant 0 : index
    %c0_15 = arith.constant 0 : index
    %21 = vector.load %arg7[%c0_14, %c0_15] : memref<8x1xf32, #tpu.memory_space<vmem>>, vector<8x1xf32>
    %22 = vector.broadcast %21 : vector<8x1xf32> to vector<8x128xf32>
    %23 = arith.addf %20, %22 : vector<8x128xf32>
    %cst_16 = arith.constant 0.000000e+00 : f32
    %24 = vector.broadcast %cst_16 : f32 to vector<8x128xf32>
    %25 = arith.maximumf %23, %24 : vector<8x128xf32>
    %c0_17 = arith.constant 0 : index
    %c0_18 = arith.constant 0 : index
    %26 = vector.load %arg8[%c0_17, %c0_18] : memref<5x8xf32, #tpu.memory_space<vmem>>, vector<5x8xf32>
    %cst_19 = arith.constant dense<0.000000e+00> : vector<5x128xf32>
    %27 = tpu.matmul %26, %25, %cst_19 {dimension_numbers = #tpu.dot_dimension_numbers<[1], [0], [0], [1], [0, 0, 1, 1], [], []>} : vector<5x8xf32>, vector<8x128xf32>, vector<5x128xf32> -> vector<5x128xf32>
    %c0_20 = arith.constant 0 : index
    %c0_21 = arith.constant 0 : index
    %28 = vector.load %arg9[%c0_20, %c0_21] : memref<5x1xf32, #tpu.memory_space<vmem>>, vector<5x1xf32>
    %29 = vector.broadcast %28 : vector<5x1xf32> to vector<5x128xf32>
    %30 = arith.addf %27, %29 : vector<5x128xf32>
    %31 = math.tanh %30 : vector<5x128xf32>
    %c0_22 = arith.constant 0 : index
    %32 = arith.index_cast %1 : i32 to index
    %33 = vector.load %arg10[%c0_22, %32] : memref<5x128xf32, #tpu.memory_space<vmem>>, vector<5x128xf32>
    tpu.vector_store %arg10[%c0_22, %32], %31 {strides = array<i32>} : memref<5x128xf32, #tpu.memory_space<vmem>>, vector<5x128xf32>,
    %c1_i32 = arith.constant 1 : i32
    return
  }
  func.func @transform_0(%arg0: i32) -> (i32, i32) {
    %c0_i32 = arith.constant 0 : i32
    %c0_i32_0 = arith.constant 0 : i32
    return %arg0, %c0_i32 : i32, i32
  }
  func.func @transform_1(%arg0: i32) -> (i32, i32) {
    %c0_i32 = arith.constant 0 : i32
    %c0_i32_0 = arith.constant 0 : i32
    %c0_i32_1 = arith.constant 0 : i32
    return %c0_i32, %c0_i32_0 : i32, i32
  }
  func.func @transform_2(%arg0: i32) -> (i32, i32) {
    %c0_i32 = arith.constant 0 : i32
    %c0_i32_0 = arith.constant 0 : i32
    %c0_i32_1 = arith.constant 0 : i32
    return %c0_i32, %c0_i32_0 : i32, i32
  }
  func.func @transform_3(%arg0: i32) -> (i32, i32) {
    %c0_i32 = arith.constant 0 : i32
    %c0_i32_0 = arith.constant 0 : i32
    %c0_i32_1 = arith.constant 0 : i32
    return %c0_i32, %c0_i32_0 : i32, i32
  }
  func.func @transform_4(%arg0: i32) -> (i32, i32) {
    %c0_i32 = arith.constant 0 : i32
    %c0_i32_0 = arith.constant 0 : i32
    %c0_i32_1 = arith.constant 0 : i32
    return %c0_i32, %c0_i32_0 : i32, i32
  }
  func.func @transform_5(%arg0: i32) -> (i32, i32) {
    %c0_i32 = arith.constant 0 : i32
    %c0_i32_0 = arith.constant 0 : i32
    %c0_i32_1 = arith.constant 0 : i32
    return %c0_i32, %c0_i32_0 : i32, i32
  }
  func.func @transform_6(%arg0: i32) -> (i32, i32) {
    %c0_i32 = arith.constant 0 : i32
    %c0_i32_0 = arith.constant 0 : i32
    %c0_i32_1 = arith.constant 0 : i32
    return %c0_i32, %c0_i32_0 : i32, i32
  }
  func.func @transform_7(%arg0: i32) -> (i32, i32) {
    %c0_i32 = arith.constant 0 : i32
    %c0_i32_0 = arith.constant 0 : i32
    %c0_i32_1 = arith.constant 0 : i32
    return %c0_i32, %c0_i32_0 : i32, i32
  }
  func.func @transform_8(%arg0: i32) -> (i32, i32) {
    %c0_i32 = arith.constant 0 : i32
    %c0_i32_0 = arith.constant 0 : i32
    %c0_i32_1 = arith.constant 0 : i32
    return %c0_i32, %c0_i32_0 : i32, i32
  }
  func.func @transform_9(%arg0: i32) -> (i32, i32) {
    %c0_i32 = arith.constant 0 : i32
    %c0_i32_0 = arith.constant 0 : i32
    return %c0_i32, %arg0 : i32, i32
  }
}

</mosaic_0001>

<bundles_post_ra>
// kernel: tpu_custom_call.1
= control target key start
LH: loop header
LB: loop body
LE: loop exit
PB: predicated region body
PF: predicated region fallthrough
CT: control target
= control target key end

     0   :  { %14 = vsyncpa [#allocation3], 0  ;;  %s613_s0 = inlined_call_operand.vmem [shape: f32[16,32], index: 0, kind: input, shape index: {}]   ;;  %s614_s1 = inlined_call_operand.vmem [shape: f32[32,32], index: 1, kind: input, shape index: {}]   ;;  %s615_s2 = inlined_call_operand.vmem [shape: f32[32,1], index: 2, kind: input, shape index: {}]   ;;  %s616_s3 = inlined_call_operand.vmem [shape: f32[16,32], index: 3, kind: input, shape index: {}]   ;;  %s617_s4 = inlined_call_operand.vmem [shape: f32[16,1], index: 4, kind: input, shape index: {}]   ;;  %s618_s5 = inlined_call_operand.hbm [shape: f32[8,16], index: 5, kind: input, shape index: {}]   ;;  %s619_s6 = inlined_call_operand.vmem [shape: f32[8,1], index: 6, kind: input, shape index: {}]   ;;  %s620_s7 = inlined_call_operand.hbm [shape: f32[5,8], index: 7, kind: input, shape index: {}]   ;;  %s621_s8 = inlined_call_operand.vmem [shape: f32[5,1], index: 8, kind: input, shape index: {}]   ;;  %s622_s9 = inlined_call_operand.hbm [shape: f32[5,16], index: 9, kind: output, shape index: {}]  }
   0x1   :  { %15 = vsyncpa [#allocation6], 0 }
   0x2   :  { %16 = vsyncpa [#allocation4], 0  ;;  %s32_s11 = sshll.u32 %s618_s5, 4  ;;  %s438_s12 = smov [#allocation2]   ;;  %s33_s11 = int_to_ptr.hbm [resolvable:$true] %s32_s11 }
   0x3   :  { %s34_s13 = sshll.u32 %s438_s12, 4  ;;  %s45_s16 = sshll.u32 %s620_s7, 4  ;;  %s35_s13 = int_to_ptr.vmem [resolvable:$true] %s34_s13  ;;  %s46_s16 = int_to_ptr.hbm [resolvable:$true] %s45_s16 }
   0x4   :  { %37 = dma.hbm_to_vmem [thread:$0]  %s33_s11, 128, %s35_s13, [#allocation3]  }
   0x5   :  { %s439_s17 = smov [#allocation5]  }
   0x6   :  { %s47_s18 = sshll.u32 %s439_s17, 4  ;;  %s48_s18 = int_to_ptr.vmem [resolvable:$true] %s47_s18 }
   0x7   :  { %50 = dma.hbm_to_vmem [thread:$0]  %s46_s16, 128, %s48_s18, [#allocation6]  }
   0x8   :  { %432 = dma.done.wait [#allocation3], 128  }
   0x9   :  { %433 = vsyncadd [#allocation3], 4294967168 }
   0xa   :  { %434 = dma.done.wait [#allocation6], 128  }
   0xb   :  { %435 = vsyncadd [#allocation6], 4294967168  ;;  %vm105_vm0 = vcmask 261120   ;;  %v76_v0 = vld [vmem:[%s613_s0 + $0x78] sm:$0xff]  ;;  %v75_v1 = vld [vmem:[%s613_s0 + $0x70] sm:$0xff]  ;;  %v440_v10 = vmov 0  }
   0xc   :  { %327 = vmatpush.xpose.msk.msra.mxu0 %vm105_vm0, %v76_v0  ;;  %v74_v2 = vld [vmem:[%s613_s0 + $0x68] sm:$0xff]  ;;  %v73_v3 = vld [vmem:[%s613_s0 + $0x60] sm:$0xff]  ;;  %v72_v4 = vld [vmem:[%s613_s0 + $0x58] sm:$0xff]  ;;  %356 = vset.pattern.permute.xlu1 %v440_v10  ;;  %vm251_vm1 = vcmask 130048   ;;  %vm283_vm2 = vcmask 64512   ;;  %s316_s28 = sshll.u32 %s622_s9, 4  ;;  %s317_s28 = int_to_ptr.hbm [resolvable:$true] %s316_s28 }
   0xd   :  { %v71_v5 = vld [vmem:[%s613_s0 + $0x50] sm:$0xff]  ;;  %v70_v6 = vld [vmem:[%s613_s0 + $0x48] sm:$0xff]  ;;  %v69_v7 = vld [vmem:[%s613_s0 + $0x40] sm:$0xff]  ;;  %355 = vset.pattern.permute.xlu0 %v440_v10  ;;  %357 = vset.pattern.permute.xlu2 %v440_v10 }
   0xe   :  { %v68_v8 = vld [vmem:[%s613_s0 + $0x38] sm:$0xff]  ;;  %v82_v9 = vld [vmem:[%s615_s2 + $0x8] sm:$0xff]  ;;  %v67_v11 = vld [vmem:[%s613_s0 + $0x30] sm:$0xff] }
   0xf   :  { %92 = vperm.xlu1 %356, %v82_v9   ;;  %v66_v12 = vld [vmem:[%s613_s0 + $0x28] sm:$0xff]  ;;  %v81_v13 = vld [vmem:[%s615_s2] sm:$0xff]  ;;  %v84_v14 = vld [vmem:[%s615_s2 + $0x18] sm:$0xff] }
  0x10   :  { %328 = vmatpush.xpose.msk.msra.mxu0 %vm105_vm0, %v75_v1  ;;  %102 = vperm.xlu0 %355, %v84_v14   ;;  %v65_v15 = vld [vmem:[%s613_s0 + $0x20] sm:$0xff]  ;;  %v64_v16 = vld [vmem:[%s613_s0 + $0x18] sm:$0xff]  ;;  %v83_v17 = vld [vmem:[%s615_s2 + $0x10] sm:$0xff] }
  0x11   :  { %v63_v18 = vld [vmem:[%s613_s0 + $0x10] sm:$0xff]  ;;  %v62_v19 = vld [vmem:[%s613_s0 + $0x8] sm:$0xff]  ;;  %v245_v20 = vld [vmem:[%s619_s6] sm:$0xff] }
  0x12   :  { %v277_v21 = vld [vmem:[%s621_s8] sm:$0x1f]  ;;  %v78_v24 = vld [vmem:[%s614_s1 + $0x8] sm:$0xff]  ;;  %v79_v25 = vld [vmem:[%s614_s1 + $0x10] sm:$0xff] }
  0x13   :  { %v61_v22 = vld [vmem:[%s613_s0] sm:$0xff]  ;;  %v80_v26 = vld [vmem:[%s614_s1 + $0x18] sm:$0xff]  ;;  %v202_v29 = vld [vmem:[%s617_s4 + $0x8] sm:$0xff] }
  0x14   :  { %329 = vmatpush.xpose.msk.msra.mxu0 %vm105_vm0, %v74_v2  ;;  %v77_v23 = vld [vmem:[%s614_s1] sm:$0xff]  ;;  %210 = vperm.xlu2 %357, %v202_v29   ;;  %v200_v46 = vld [vmem:[%s616_s3 + $0x8] sm:$0xff] }
  0x15   :  { %v201_v33 = vld [vmem:[%s617_s4] sm:$0xff]  ;;  %v276_v60 = vld [vmem:[#allocation5] sm:$0x1f] }
  0x16   :  { %v199_v45 = vld [vmem:[%s616_s3] sm:$0xff]  ;;  %s441_s3 = smov [#allocation7]  }
  0x17   :  { %87 = vperm.xlu1 %356, %v81_v13   ;;  %v244_v55 = vld [vmem:[#allocation2] sm:$0xff]  ;;  %s314_s25 = sshll.u32 %s441_s3, 4  ;;  %s315_s25 = int_to_ptr.vmem [resolvable:$true] %s314_s25 }
  0x18   :  { %330 = vmatpush.xpose.msk.msra.mxu0 %vm105_vm0, %v73_v3  ;;  %97 = vperm.xlu0 %355, %v83_v17  }
  0x1c   :  { %331 = vmatpush.xpose.msk.msra.mxu0 %vm105_vm0, %v72_v4  ;;  %205 = vperm.xlu2 %357, %v201_v33  }
  0x1f   :  { %280 = vperm.xlu1 %356, %v277_v21  }
  0x20   :  { %332 = vmatpush.xpose.msk.msra.mxu0 %vm105_vm0, %v71_v5  ;;  %248 = vperm.xlu0 %355, %v245_v20  }
  0x24   :  { %333 = vmatpush.xpose.msk.msra.mxu0 %vm105_vm0, %v70_v6 }
  0x28   :  { %334 = vmatpush.xpose.msk.msra.mxu0 %vm105_vm0, %v69_v7 }
  0x2c   :  { %335 = vmatpush.xpose.msk.msra.mxu0 %vm105_vm0, %v68_v8 }
  0x30   :  { %336 = vmatpush.xpose.msk.msra.mxu0 %vm105_vm0, %v67_v11 }
  0x34   :  { %337 = vmatpush.xpose.msk.msra.mxu0 %vm105_vm0, %v66_v12 }
  0x38   :  { %338 = vmatpush.xpose.msk.msra.mxu0 %vm105_vm0, %v65_v15 }
  0x3c   :  { %339 = vmatpush.xpose.msk.msra.mxu0 %vm105_vm0, %v64_v16 }
  0x40   :  { %340 = vmatpush.xpose.msk.msra.mxu0 %vm105_vm0, %v63_v18 }
  0x44   :  { %341 = vmatpush.xpose.msk.msra.mxu0 %vm105_vm0, %v62_v19 }
  0x48   :  { %342 = vmatpush.xpose.msk.msra.mxu0 %vm105_vm0, %v61_v22 }
  0x4b   :  { %343 = vmatmul.msk.f32.vlgmr.msra.gmra.mxu0 %vm105_vm0, %v77_v23 }
  0x53   :  { %344 = vmatmul.msk.f32.gmra.mxu0 %vm105_vm0, %v78_v24 }
  0x5b   :  { %345 = vmatmul.msk.f32.gmra.mxu0 %vm105_vm0, %v79_v25 }
  0x63   :  { %346 = vmatmul.msk.f32.gmra.mxu0 %vm105_vm0, %v80_v26 }
  0x6e   :  { %v211_v47 = vpop.permute.xlu2 %210 }
  0x76   :  { %v206_v49 = vpop.permute.xlu2 %205 }
  0x81   :  { %v93_v31 = vpop.permute.xlu1 %92 }
  0x82   :  { %v103_v30 = vpop.permute.xlu0 %102 }
  0x89   :  { %v88_v38 = vpop.permute.xlu1 %87 }
  0x8a   :  { %v98_v34 = vpop.permute.xlu0 %97 }
  0x91   :  { %v281_v61 = vpop.permute.xlu1 %280 }
  0x92   :  { %v249_v56 = vpop.permute.xlu0 %248 }
  0xc8   :  { %v183_v27 = vpop.f32.mrf.mxu0 }
  0xc9   :  { %v184_v41 = vadd.f32 %v183_v27, %v88_v38 }
  0xcb   :  { %v195_v44 = vmax.f32 %v184_v41, 0.0 }
  0xd0   :  { %v186_v28 = vpop.f32.mrf.mxu0 }
  0xd1   :  { %v187_v39 = vadd.f32 %v186_v28, %v93_v31 }
  0xd3   :  { %v196_v43 = vmax.f32 %v187_v39, 0.0 }
  0xd8   :  { %v189_v32 = vpop.f32.mrf.mxu0 }
  0xd9   :  { %v190_v36 = vadd.f32 %v189_v32, %v98_v34 }
  0xdb   :  { %v197_v42 = vmax.f32 %v190_v36, 0.0 }
  0xe0   :  { %v192_v35 = vpop.f32.mrf.mxu0 }
  0xe1   :  { %v193_v37 = vadd.f32 %v192_v35, %v103_v30 }
  0xe3   :  { %v198_v40 = vmax.f32 %v193_v37, 0.0 }
  0xe5   :  { %231 = vmatpush.msra.mxu1 %v198_v40 }
  0xe7   :  { %232 = vmatpush.msra.mxu1 %v197_v42 }
  0xe9   :  { %233 = vmatpush.msra.mxu1 %v196_v43 }
  0xeb   :  { %234 = vmatpush.msra.mxu1 %v195_v44 }
  0xec   :  { %347 = vmatmul.msk.f32.vlgmr.msra.gmra.mxu1 %vm105_vm0, %v199_v45 }
  0xf4   :  { %348 = vmatmul.msk.f32.gmra.mxu1 %vm105_vm0, %v200_v46 }
 0x169   :  { %v236_v48 = vpop.f32.mrf.mxu1 }
 0x16a   :  { %v237_v51 = vadd.f32 %v236_v48, %v206_v49 }
 0x16c   :  { %v242_v54 = vmax.f32 %v237_v51, 0.0 }
 0x171   :  { %v239_v50 = vpop.f32.mrf.mxu1 }
 0x172   :  { %v240_v52 = vadd.f32 %v239_v50, %v211_v47 }
 0x174   :  { %v243_v53 = vmax.f32 %v240_v52, 0.0 }
 0x176   :  { %269 = vmatpush.msra.mxu2 %v243_v53 }
 0x178   :  { %270 = vmatpush.msra.mxu2 %v242_v54 }
 0x179   :  { %349 = vmatmul.msk.f32.vlgmr.msra.gmra.mxu2 %vm251_vm1, %v244_v55 }
 0x1fc   :  { %v272_v57 = vpop.f32.mrf.mxu2 }
 0x1fd   :  { %v273_v58 = vadd.f32 %v272_v57, %v249_v56 }
 0x1ff   :  { %v275_v59 = vmax.f32 %v273_v58, 0.0 }
 0x201   :  { %302 = vmatpush.msra.mxu3 %v275_v59 }
 0x202   :  { %350 = vmatmul.msk.f32.vlgmr.msra.gmra.mxu3 %vm283_vm2, %v276_v60 }
 0x285   :  { %v304_v62 = vpop.f32.mrf.mxu3 }
 0x286   :  { %v305_v63 = vadd.f32 %v304_v62, %v281_v61 }
 0x288   :  { %358 = vtanh.f32 %v305_v63 }
 0x28e   :  { %v359_v0 = vpop.eup %358 }
 0x28f   :  { %308 = vst [vmem:[#allocation7] sm:$0x1f] %v359_v0 }
 0x290   :  { %319 = dma.vmem_to_hbm [thread:$0]  %s315_s25, 128, %s317_s28, [#allocation4]  }
 0x291   :  { %436 = dma.done.wait [#allocation4], 128  }
 0x292   :  { %437 = vsyncadd [#allocation4], 4294967168 }
 0x293   :  { %324 = vsyncpa [#allocation3], 1 }
 0x294   :  { %325 = vsyncpa [#allocation6], 1 }
 0x295   :  { %326 = vsyncpa [#allocation4], 1 }

</bundles_post_ra>
